<compile_context>
chip_gen: v7x
topology: tpu7x:2x2x1
jax: 0.10.0
libtpu: 0.0.40
codegen_flags: <defaults>
</compile_context>

<pallas_src>
import jax
import jax.numpy as jnp
from jax.experimental import pallas as pl
from jax.experimental.pallas import tpu as pltpu

_LANE = 128


def _round_up(x: int, m: int) -> int:
    return ((x + m - 1) // m) * m


def _pick_lane(total: int):
    """Largest lane width in {1024, 512, 256, 128} that divides `total`."""
    for lane in (1024, 512, 256, 128):
        if total % lane == 0:
            return lane
    return None


def _gaussian_kernel(scale_ref, d_ref, o_ref):
    # scale_ref: (1,) f32 in SMEM, holds -1/(2*variance).
    # mul on the VPU, exp on the EUP; both trivially below the HBM roofline.
    d = d_ref[...].astype(jnp.float32)
    o_ref[...] = jnp.exp((d * d) * scale_ref[0]).astype(o_ref.dtype)


def gaussian_prior(distances: jax.Array, variance, *,
                   block_m: int = 1024,
                   min_kernel_elements: int = 32768,
                   use_kernel: bool = None) -> jax.Array:
    """Pallas implementation of GaussianPrior.forward(distances)."""
    orig_shape = distances.shape
    dtype = distances.dtype
    total = distances.size

    lane = _pick_lane(total) if total > 0 else None
    if use_kernel is None:
        use_kernel = (lane is not None) and (total >= min_kernel_elements)

    if not use_kernel or lane is None:
        # Small / ragged fallback: one fused XLA elementwise pass is already at
        # the HBM roofline for this op, and skips all pallas_call fixed cost.
        d = distances.astype(jnp.float32)
        out = jnp.exp(-(d * d) / (2.0 * jnp.asarray(variance, dtype=jnp.float32)))
        return out.astype(dtype)

    rows = total // lane
    # Contiguous reshape to a lane-dense slab: free (no HBM copy).
    x2d = distances.reshape(rows, lane)

    # Sublane granularity depends on element width (8 for 4B, 16 for 2B, ...).
    itemsize = jnp.dtype(dtype).itemsize
    sublane = max(8, 32 // max(itemsize, 1))

    # Block rows: big (up to block_m) but never more than needed; keep it a
    # sublane multiple.  Halve until the parallel grid has >= 2 steps so both
    # v7x TensorCores get work.
    bm = _round_up(min(block_m, _round_up(rows, sublane)), sublane)
    while bm > sublane and pl.cdiv(rows, bm) < 2:
        bm = _round_up(max(sublane, bm // 2), sublane)

    grid = (pl.cdiv(rows, bm),)  # ragged final block is masked by Pallas

    # -1 / (2 * variance); (1,)-f32 SMEM operand.
    scale = (-0.5 / jnp.asarray(variance, dtype=jnp.float32)).reshape(1)

    out2d = pl.pallas_call(
        _gaussian_kernel,
        out_shape=jax.ShapeDtypeStruct((rows, lane), dtype),
        grid_spec=pltpu.PrefetchScalarGridSpec(
            num_scalar_prefetch=0,
            grid=grid,
            in_specs=[
                pl.BlockSpec(memory_space=pltpu.MemorySpace.SMEM),  # scale (1,)
                pl.BlockSpec((bm, lane), lambda i: (i, 0)),         # distances slab
            ],
            out_specs=pl.BlockSpec((bm, lane), lambda i: (i, 0)),
        ),
        compiler_params=pltpu.CompilerParams(
            dimension_semantics=("parallel",),
            vmem_limit_bytes=40 << 20,   # 4 MiB blocks x2 bufs x(in+out) = 16 MiB
        ),
    )(scale, x2d)

    # Zero-copy reshape back; no [:total] slice needed (slab is exactly total).
    return out2d.reshape(orig_shape)


class GaussianPrior:
    """JAX/Pallas port of prototorch.models.extras.GaussianPrior."""

    def __init__(self, variance):
        # Note: variance <= 0 yields inf/NaN, matching the PyTorch reference.
        self.variance = float(variance)

    def __call__(self, distances: jax.Array) -> jax.Array:
        return gaussian_prior(distances, self.variance)


if __name__ == "__main__":
    key = jax.random.PRNGKey(0)
    k1, k2 = jax.random.split(key)
    variance = 1.5
    module = GaussianPrior(variance)

    # Case 1: small, module-typical shape (batch, num_prototypes) -> wrapper
    # auto-falls back to the fused XLA path.
    d_small = jax.random.uniform(k1, (32, 12), jnp.float32, minval=0.0, maxval=4.0)
    out_small = jax.block_until_ready(module(d_small))
    ref_small = jnp.exp(-(d_small * d_small) / (2.0 * variance))
    assert out_small.shape == d_small.shape and out_small.dtype == d_small.dtype
    assert jnp.allclose(out_small, ref_small, atol=1e-5, rtol=1e-5)

    # Case 2: Pallas kernel path.  total = 520*256 = 130*1024 -> lane=1024,
    # rows=130: exercises the zero-copy slab, a >=2-step parallel grid and a
    # masked partial final row-block.
    d_big = jax.random.uniform(k2, (520, 256), jnp.float32, minval=0.0, maxval=4.0)
    out_big = jax.block_until_ready(gaussian_prior(d_big, variance, use_kernel=True))
    ref_big = jnp.exp(-(d_big * d_big) / (2.0 * variance))
    assert out_big.shape == d_big.shape and out_big.dtype == d_big.dtype
    assert jnp.allclose(out_big, ref_big, atol=1e-5, rtol=1e-5)

    print("KERNEL_OK")
</pallas_src>

<mosaic_0001>
module attributes {stable_mosaic.version = 11 : i64} {
  func.func @_gaussian_kernel(%arg0: i32, %arg1: memref<1xf32, #tpu.memory_space<smem>>, %arg2: memref<72x1024xf32, #tpu.memory_space<vmem>>, %arg3: memref<72x1024xf32, #tpu.memory_space<vmem>>) attributes {dimension_semantics = [#tpu.dimension_semantics<parallel>], iteration_bounds = array<i64: 2>, scalar_prefetch = 0 : i64, scratch_operands = 0 : i64, tpu.core_type = #tpu.core_type<tc>, window_params = [{transform_indices = @transform_0, window_bounds = array<i64: 1>}, {transform_indices = @transform_1, window_bounds = array<i64: 72, 1024>}, {transform_indices = @transform_2, window_bounds = array<i64: 72, 1024>}]} {
    %c0 = arith.constant 0 : index
    %c0_0 = arith.constant 0 : index
    %0 = vector.load %arg2[%c0, %c0_0] : memref<72x1024xf32, #tpu.memory_space<vmem>>, vector<72x1024xf32>
    %1 = arith.mulf %0, %0 : vector<72x1024xf32>
    %c0_1 = arith.constant 0 : index
    %2 = memref.load %arg1[%c0_1] : memref<1xf32, #tpu.memory_space<smem>>
    %3 = vector.broadcast %2 : f32 to vector<72x1024xf32>
    %4 = arith.mulf %1, %3 : vector<72x1024xf32>
    %5 = math.exp %4 : vector<72x1024xf32>
    %c0_2 = arith.constant 0 : index
    %c0_3 = arith.constant 0 : index
    %6 = vector.load %arg3[%c0_2, %c0_3] : memref<72x1024xf32, #tpu.memory_space<vmem>>, vector<72x1024xf32>
    tpu.vector_store %arg3[%c0_2, %c0_3], %5 {strides = array<i32>} : memref<72x1024xf32, #tpu.memory_space<vmem>>, vector<72x1024xf32>,
    return
  }
  func.func @transform_0(%arg0: i32) -> i32 {
    %c0_i32 = arith.constant 0 : i32
    %c0_i32_0 = arith.constant 0 : i32
    return %c0_i32 : i32
  }
  func.func @transform_1(%arg0: i32) -> (i32, i32) {
    %c0_i32 = arith.constant 0 : i32
    %c0_i32_0 = arith.constant 0 : i32
    return %arg0, %c0_i32 : i32, i32
  }
  func.func @transform_2(%arg0: i32) -> (i32, i32) {
    %c0_i32 = arith.constant 0 : i32
    %c0_i32_0 = arith.constant 0 : i32
    return %arg0, %c0_i32 : i32, i32
  }
}

</mosaic_0001>

<bundles_post_ra>
// kernel: tpu_custom_call.1
= control target key start
LH: loop header
LB: loop body
LE: loop exit
PB: predicated region body
PF: predicated region fallthrough
CT: control target
= control target key end

     0   :  { %s1446_s0 = inlined_call_operand.<no memory space> [shape: f32[1], index: 0, kind: input, shape index: {}]   ;;  %s1447_s1 = inlined_call_operand.hbm [shape: f32[130,1024], index: 1, kind: input, shape index: {}]   ;;  %s1448_s2 = inlined_call_operand.hbm [shape: f32[130,1024], index: 2, kind: output, shape index: {}]  }
   0x1   :  { %7 = sst [smem:[#allocation2]] %s1446_s0 }
   0x2   :  { %8 = vsyncpa [#allocation4], 0 }
   0x3   :  { %10 = vsyncpa [#allocation4 + $0x1], 0 }
   0x4   :  { %11 = vsyncpa [#allocation5], 0 }
   0x5   :  { %13 = vsyncpa [#allocation5 + $0x1], 0  ;;  %s1049_s11 = smov 0   ;;  %s1051_s12 = smov 0  }
   0x6   :  { %s1053_s13 = smov 0   ;;  %s1055_s14 = smov 0  }
   0x7 LB: > { %s1070_s0 = sadd.s32 4294967295, %s1023_s14   ;;  %s712_s15 = sadd.s32 4294967294, %s1023_s14   ;;  %s1023_s14 = sphi %s1055_s14, %s1458_s14   ;;  %s1019_s13 = sphi %s1053_s13, %s1457_s13   ;;  %s1015_s12 = sphi %s1051_s12, %s1456_s12   ;;  %s1011_s11 = sphi %s1049_s11, %s1455_s11  }
   0x8   : > { %s1074_s16 = sadd.s32 1, %s1023_s14   ;;  %s47_s17 = sadd.s32 1, %s1019_s13 }
   0x9   : > { %s44_s18 = ssub.s32 %s1023_s14, %s1074_s16  ;;  %p54_p0 = scmp.ne.s32.totalorder %s1019_s13, %s1015_s12 }
   0xa   : > { %p45_p1 = scmp.eq.s32.totalorder %s44_s18, 0  ;;  %p55_p2 = scmp.eq.s32.totalorder %s1023_s14, 0 }
   0xb   : > { %p60_p3 = scmp.ne.s32.totalorder %s1015_s12, %s1011_s11  ;;  %p61_p4 = scmp.eq.s32.totalorder %s1070_s0, 0 }
   0xc   : > { %s1086_s19 = scalar_select %p45_p1, %s1019_s13, %s47_s17  }
   0xd   : > { %p56_p5 = por %p55_p2, %p54_p0  ;;  %p1088_p6 = por %p61_p4, %p60_p3 }
   0xe   : > { %p84_p7 = scmp.eq.s32.totalorder %s1070_s0, 1  ;;  %p90_p8 = scmp.eq.s32.totalorder %s712_s15, 1 }
   0xf   : > { %p1449_p11 = scmp.ge.s32.totalorder %s1023_s14, 2 }
  0x10   : > { %p1093_p9 = por %p84_p7, %p54_p0  ;;  %p1097_p10 = por %p90_p8, %p60_p3 }
  0x11   : > { %109 = sbr.rel (%p1449_p11) target bundleno = 59 (0x3b), region = 20 }
  0x12   : > { %s1452_s22 = scalar_select %p1097_p10, 1, 0 }
  0x18   : > { %112 = sbr.rel (!%p56_p5) target bundleno = 59 (0x3b), region = 24  ;;  %s113_s23 = sand.u32 (%p56_p5), 1, %s1019_s13  }
  0x19   : > { %s118_s24 = smul.u32 (%p56_p5), 9, %s1023_s14  ;;  %s1109_s29 = scalar_lea.sflag (%p56_p5), [#allocation4], %s113_s23 }
  0x1a   : > { %s740_s25 = smul.u32 (%p56_p5), 576, %s113_s23 }
  0x1b   : > { %s119_s26 = ssub.s32 (%p56_p5), 17, %s118_s24 }
  0x1c   : > { %p120_p12 = scmp.lt.s32.totalorder (%p56_p5), %s119_s26, 9  ;;  %s117_s30 = scalar_lea.vmem (%p56_p5), [#allocation3], %s740_s25 }
  0x1f   : > { %s1460_s26 = smov (!%p120_p12, %s119_s26), 9 }
  0x20   : > { %s1106_s27 = sshll.u32 %s1460_s26, 10 }
  0x21   : > { %s125_s28 = ssub.s32 9216, %s1106_s27 }
  0x22   : > { %126 = vsyncadd %s1109_s29, %s125_s28  ;;  %p717_p13 = scmp.ne.s32.totalorder %s1106_s27, 0  ;;  %s738_s3 = smul.u32 9216, %s1023_s14 }
  0x23   : > { %s132_s4 = sshll.u32 %s117_s30, 4  ;;  %s933_s15 = scalar_lea.hbm %s1447_s1, 17408  ;;  %s1119_s4 = int_to_ptr.vmem [resolvable:$true] %s132_s4 }
  0x24   : > { %s1117_s7 = scalar_lea.hbm %s1447_s1, %s738_s3 }
  0x25   : > { %s929_s8 = scalar_lea.hbm %s1117_s7, %s1106_s27  ;;  %p934_p3 = scmp.lt.u32.totalorder %s1117_s7, %s1447_s1 }
  0x26   : > { %p930_p0 = scmp.ne.s32.totalorder %s1117_s7, %s929_s8  ;;  %p935_p4 = scmp.lt.u32.totalorder %s933_s15, %s929_s8 }
  0x27   : > { %p937_p7 = scmp.lt.u32.totalorder %s929_s8, %s1117_s7 }
  0x28   : > { %p931_p1 = pnand %p930_p0, %p717_p13  ;;  %p936_p5 = por %p935_p4, %p934_p3 }
  0x2a   : > { %p932_p2 = pneg %p931_p1  ;;  %p938_p8 = por %p937_p7, %p936_p5 }
  0x2c   : > { %p939_p12 = pnand %p938_p8, %p932_p2 }
  0x2e   : > { %942 = shalt.err (!%p939_p12)
}
  0x2f   : > { %s943_s23 = scalar_lea.vmem %s1119_s4, %s1106_s27  ;;  %s1025_s24 = smov [#allocation3]  }
  0x30   : > { %p944_p0 = scmp.ne.s32.totalorder %s1119_s4, %s943_s23  ;;  %s947_s25 = sshll.u32 %s1025_s24, 4  ;;  %s948_s25 = int_to_ptr.vmem [resolvable:$false] %s947_s25 }
  0x31   : > { %s949_s26 = scalar_lea.vmem %s948_s25, 18432  ;;  %p950_p10 = scmp.lt.s32.totalorder %s1119_s4, %s948_s25 }
  0x32   : > { %p945_p1 = pnand %p944_p0, %p717_p13  ;;  %p951_p3 = scmp.lt.s32.totalorder %s949_s26, %s943_s23 }
  0x34   : > { %p946_p11 = pneg %p945_p1  ;;  %p952_p4 = por %p951_p3, %p950_p10 }
  0x36   : > { %p953_p5 = pnand %p952_p4, %p946_p11 }
  0x38   : > { %956 = shalt.err (!%p953_p5)
}
  0x39   : > { %s1026_s28 = smov 1024   ;;  %s1027_s30 = smov 64  }
  0x3a   : > { %138 = dma.hbm_to_vmem [thread:$0]  (%p717_p13), %s1117_s7, %s1106_s27, %s1119_s4, %s1109_s29, %s1026_s28, %s1026_s28, %s1027_s30  }
  0x3b PF: > { %p722_p2 = scmp.ge.s32.totalorder %s1023_s14, 1  ;;  %p140_p7 = scmp.lt.s32.totalorder %s1023_s14, 3 }
  0x3d   : > { %p141_p8 = pnand %p722_p2, %p140_p7 }
  0x3e   : > { %s1149_s3 = sand.u32 (!%p141_p8), 1, %s1015_s12  }
  0x3f   : > { %144 = sbr.rel (%p141_p8) target bundleno = 193 (0xc1), region = 28  ;;  %s147_s6 = scalar_lea.sflag (!%p141_p8), [#allocation4], %s1149_s3 }
  0x40   : > { %s741_s5 = smul.u32 (!%p141_p8), 576, %s1149_s3 }
  0x42   : > { %s1155_s8 = scalar_lea.vmem (!%p141_p8), [#allocation3], %s741_s5 }
  0x46   : > { %1002 = dma.done.wait (%p1088_p6), %s147_s6, 9216  }
  0x47   : > { %1004 = vsyncadd (%p1088_p6), %s147_s6, 4294958080  ;;  %s327_s27 = sld [smem:[#allocation2]]  ;;  %v183_v0 = vld [vmem:[%s1155_s8] sm:$0xff]  ;;  %v184_v2 = vld [vmem:[%s1155_s8 + $0x8] sm:$0xff]  ;;  %s1208_s20 = scalar_lea.vmem [#allocation6], %s741_s5 }
  0x48   : > { %v185_v3 = vld [vmem:[%s1155_s8 + $0x10] sm:$0xff]  ;;  %v255_v4 = vmul.f32 %v183_v0, %v183_v0  ;;  %v256_v5 = vmul.f32 %v184_v2, %v184_v2  ;;  %v186_v7 = vld [vmem:[%s1155_s8 + $0x18] sm:$0xff]  ;;  %v187_v8 = vld [vmem:[%s1155_s8 + $0x20] sm:$0xff]  ;;  %s618_s29 = scalar_lea.sflag [#allocation5], %s1149_s3  ;;  %s625_s4 = smul.u32 (%p1093_p9), 9, %s1070_s0 }
  0x49   : > { %v257_v6 = vmul.f32 %v185_v3, %v185_v3  ;;  %v188_v9 = vld [vmem:[%s1155_s8 + $0x28] sm:$0xff]  ;;  %v258_v10 = vmul.f32 %v186_v7, %v186_v7  ;;  %v259_v11 = vmul.f32 %v187_v8, %v187_v8  ;;  %v189_v13 = vld [vmem:[%s1155_s8 + $0x30] sm:$0xff]  ;;  %v190_v14 = vld [vmem:[%s1155_s8 + $0x38] sm:$0xff] }
  0x4a   : > { %v260_v12 = vmul.f32 %v188_v9, %v188_v9  ;;  %v261_v18 = vmul.f32 %v189_v13, %v189_v13  ;;  %v191_v19 = vld [vmem:[%s1155_s8 + $0x40] sm:$0xff]  ;;  %v192_v20 = vld [vmem:[%s1155_s8 + $0x48] sm:$0xff]  ;;  %v262_v24 = vmul.f32 %v190_v14, %v190_v14  ;;  %v193_v25 = vld [vmem:[%s1155_s8 + $0x50] sm:$0xff]  ;;  %s626_s7 = ssub.s32 (%p1093_p9), 17, %s625_s4 }
  0x4b   : > { %v194_v26 = vld [vmem:[%s1155_s8 + $0x58] sm:$0xff]  ;;  %v195_v27 = vld [vmem:[%s1155_s8 + $0x60] sm:$0xff]  ;;  %v263_v37 = vmul.f32 %v191_v19, %v191_v19  ;;  %v264_v38 = vmul.f32 %v192_v20, %v192_v20  ;;  %v196_v39 = vld [vmem:[%s1155_s8 + $0x68] sm:$0xff]  ;;  %v265_v41 = vmul.f32 %v193_v25, %v193_v25  ;;  %p627_p6 = scmp.lt.s32.totalorder (%p1093_p9), %s626_s7, 9 }
  0x4c   : > { %v266_v42 = vmul.f32 %v194_v26, %v194_v26  ;;  %v267_v45 = vmul.f32 %v195_v27, %v195_v27  ;;  %v268_v48 = vmul.f32 %v196_v39, %v196_v39  ;;  %v197_v49 = vld [vmem:[%s1155_s8 + $0x70] sm:$0xff]  ;;  %v198_v50 = vld [vmem:[%s1155_s8 + $0x78] sm:$0xff]  ;;  %v199_v54 = vld [vmem:[%s1155_s8 + $0x80] sm:$0xff] }
  0x4d   : > { %v1162_v1 = vstv %s327_s27  ;;  %v200_v55 = vld [vmem:[%s1155_s8 + $0x88] sm:$0xff]  ;;  %v201_v59 = vld [vmem:[%s1155_s8 + $0x90] sm:$0xff]  ;;  %v269_v61 = vmul.f32 %v197_v49, %v197_v49  ;;  %v270_v62 = vmul.f32 %v198_v50, %v198_v50  ;;  %v202_v63 = vld [vmem:[%s1155_s8 + $0x98] sm:$0xff]  ;;  %v271_v2 = vmul.f32 %v199_v54, %v199_v54 }
  0x4e   : > { %v329_v15 = vmul.f32 %v1162_v1, %v255_v4  ;;  %v330_v16 = vmul.f32 %v1162_v1, %v256_v5  ;;  %v331_v17 = vmul.f32 %v1162_v1, %v257_v6  ;;  %v332_v21 = vmul.f32 %v1162_v1, %v258_v10  ;;  %v203_v10 = vld [vmem:[%s1155_s8 + $0xa0] sm:$0xff]  ;;  %v208_v27 = vld [vmem:[%s1155_s8 + $0xc8] sm:$0xff] }
  0x4f   : > { %v333_v22 = vmul.f32 %v1162_v1, %v259_v11  ;;  %v334_v23 = vmul.f32 %v1162_v1, %v260_v12  ;;  %v335_v31 = vmul.f32 %v1162_v1, %v261_v18  ;;  %v336_v35 = vmul.f32 %v1162_v1, %v262_v24  ;;  %v204_v11 = vld [vmem:[%s1155_s8 + $0xa8] sm:$0xff] }
  0x50   : > { %v401_v28 = vmul.f32 1.442695, %v329_v15  ;;  %v403_v29 = vmul.f32 1.442695, %v330_v16  ;;  %v405_v30 = vmul.f32 1.442695, %v331_v17  ;;  %v337_v43 = vmul.f32 %v1162_v1, %v263_v37 }
  0x51   : > { %v407_v32 = vmul.f32 1.442695, %v332_v21  ;;  %v409_v33 = vmul.f32 1.442695, %v333_v22  ;;  %v411_v34 = vmul.f32 1.442695, %v334_v23  ;;  %v338_v44 = vmul.f32 %v1162_v1, %v264_v38 }
  0x52   : > { %785 = vpow2.f32 %v401_v28  ;;  %v413_v36 = vmul.f32 1.442695, %v335_v31  ;;  %v415_v40 = vmul.f32 1.442695, %v336_v35  ;;  %v339_v46 = vmul.f32 %v1162_v1, %v265_v41  ;;  %v205_v16 = vld [vmem:[%s1155_s8 + $0xb0] sm:$0xff]  ;;  %v206_v17 = vld [vmem:[%s1155_s8 + $0xb8] sm:$0xff] }
  0x53   : > { %787 = vpow2.f32 %v403_v29  ;;  %v340_v47 = vmul.f32 %v1162_v1, %v266_v42  ;;  %v417_v51 = vmul.f32 1.442695, %v337_v43  ;;  %v419_v52 = vmul.f32 1.442695, %v338_v44  ;;  %v207_v22 = vld [vmem:[%s1155_s8 + $0xc0] sm:$0xff]  ;;  %v210_v41 = vld [vmem:[%s1155_s8 + $0xd8] sm:$0xff] }
  0x54   : > { %789 = vpow2.f32 %v405_v30  ;;  %v341_v53 = vmul.f32 %v1162_v1, %v267_v45  ;;  %v421_v56 = vmul.f32 1.442695, %v339_v46  ;;  %v342_v58 = vmul.f32 %v1162_v1, %v268_v48  ;;  %v211_v46 = vld [vmem:[%s1155_s8 + $0xe0] sm:$0xff] }
  0x55   : > { %791 = vpow2.f32 %v407_v32  ;;  %v423_v57 = vmul.f32 1.442695, %v340_v47  ;;  %v272_v3 = vmul.f32 %v200_v55, %v200_v55  ;;  %v343_v4 = vmul.f32 %v1162_v1, %v269_v61  ;;  %v212_v47 = vld [vmem:[%s1155_s8 + $0xe8] sm:$0xff] }
  0x56   : > { %793 = vpow2.f32 %v409_v33  ;;  %v425_v60 = vmul.f32 1.442695, %v341_v53  ;;  %v427_v0 = vmul.f32 1.442695, %v342_v58  ;;  %v344_v5 = vmul.f32 %v1162_v1, %v270_v62 }
  0x57   : > { %795 = vpow2.f32 %v411_v34  ;;  %v273_v6 = vmul.f32 %v201_v59, %v201_v59  ;;  %v345_v7 = vmul.f32 %v1162_v1, %v271_v2  ;;  %v346_v8 = vmul.f32 %v1162_v1, %v272_v3 }
  0x58   : > { %797 = vpow2.f32 %v413_v36  ;;  %v274_v9 = vmul.f32 %v202_v63, %v202_v63  ;;  %v429_v13 = vmul.f32 1.442695, %v343_v4  ;;  %v431_v14 = vmul.f32 1.442695, %v344_v5 }
  0x59   : > { %799 = vpow2.f32 %v415_v40  ;;  %v347_v15 = vmul.f32 %v1162_v1, %v273_v6  ;;  %v433_v19 = vmul.f32 1.442695, %v345_v7  ;;  %v435_v20 = vmul.f32 1.442695, %v346_v8  ;;  %v209_v40 = vld [vmem:[%s1155_s8 + $0xd0] sm:$0xff]  ;;  %v215_v7 = vld [vmem:[%s1155_s8 + $0x100] sm:$0xff] }
  0x5a   : > { %801 = vpow2.f32 %v417_v51  ;;  %v348_v21 = vmul.f32 %v1162_v1, %v274_v9  ;;  %v275_v25 = vmul.f32 %v203_v10, %v203_v10  ;;  %v276_v26 = vmul.f32 %v204_v11, %v204_v11  ;;  %v216_v8 = vld [vmem:[%s1155_s8 + $0x108] sm:$0xff] }
  0x5b   : > { %803 = vpow2.f32 %v419_v52  ;;  %v437_v24 = vmul.f32 1.442695, %v347_v15  ;;  %v277_v30 = vmul.f32 %v205_v16, %v205_v16  ;;  %v278_v31 = vmul.f32 %v206_v17, %v206_v17  ;;  %v213_v52 = vld [vmem:[%s1155_s8 + $0xf0] sm:$0xff] }
  0x5c   : > { %v786_v12 = vpop.eup %785  ;;  %805 = vpow2.f32 %v421_v56  ;;  %v439_v29 = vmul.f32 1.442695, %v348_v21  ;;  %v349_v33 = vmul.f32 %v1162_v1, %v275_v25  ;;  %v350_v34 = vmul.f32 %v1162_v1, %v276_v26 }
  0x5d   : > { %v788_v18 = vpop.eup %787  ;;  %545 = vst [vmem:[%s1208_s20] sm:$0xff] %v786_v12  ;;  %807 = vpow2.f32 %v423_v57  ;;  %v279_v35 = vmul.f32 %v207_v22, %v207_v22  ;;  %v351_v37 = vmul.f32 %v1162_v1, %v277_v30  ;;  %v352_v38 = vmul.f32 %v1162_v1, %v278_v31  ;;  %v214_v57 = vld [vmem:[%s1155_s8 + $0xf8] sm:$0xff] }
  0x5e   : > { %v790_v23 = vpop.eup %789  ;;  %546 = vst [vmem:[%s1208_s20 + $0x8] sm:$0xff] %v788_v18  ;;  %809 = vpow2.f32 %v425_v60  ;;  %v280_v39 = vmul.f32 %v208_v27, %v208_v27  ;;  %v441_v43 = vmul.f32 1.442695, %v349_v33  ;;  %v443_v44 = vmul.f32 1.442695, %v350_v34 }
  0x5f   : > { %v792_v28 = vpop.eup %791  ;;  %547 = vst [vmem:[%s1208_s20 + $0x10] sm:$0xff] %v790_v23  ;;  %811 = vpow2.f32 %v427_v0  ;;  %v353_v45 = vmul.f32 %v1162_v1, %v279_v35  ;;  %v445_v49 = vmul.f32 1.442695, %v351_v37  ;;  %v447_v50 = vmul.f32 1.442695, %v352_v38  ;;  %v221_v37 = vld [vmem:[%s1155_s8 + $0x130] sm:$0xff] }
  0x60   : > { %v794_v32 = vpop.eup %793  ;;  %548 = vst [vmem:[%s1208_s20 + $0x18] sm:$0xff] %v792_v28  ;;  %813 = vpow2.f32 %v429_v13  ;;  %v354_v51 = vmul.f32 %v1162_v1, %v280_v39  ;;  %v281_v55 = vmul.f32 %v209_v40, %v209_v40  ;;  %v282_v56 = vmul.f32 %v210_v41, %v210_v41  ;;  %v217_v13 = vld [vmem:[%s1155_s8 + $0x110] sm:$0xff]  ;;  %v222_v38 = vld [vmem:[%s1155_s8 + $0x138] sm:$0xff] }
  0x61   : > { %v796_v36 = vpop.eup %795  ;;  %549 = vst [vmem:[%s1208_s20 + $0x20] sm:$0xff] %v794_v32  ;;  %815 = vpow2.f32 %v431_v14  ;;  %v449_v54 = vmul.f32 1.442695, %v353_v45  ;;  %v283_v60 = vmul.f32 %v211_v46, %v211_v46  ;;  %v284_v61 = vmul.f32 %v212_v47, %v212_v47  ;;  %v218_v14 = vld [vmem:[%s1155_s8 + $0x118] sm:$0xff] }
  0x62   : > { %v798_v42 = vpop.eup %797  ;;  %550 = vst [vmem:[%s1208_s20 + $0x28] sm:$0xff] %v796_v36  ;;  %817 = vpow2.f32 %v433_v19  ;;  %v451_v59 = vmul.f32 1.442695, %v354_v51  ;;  %v355_v63 = vmul.f32 %v1162_v1, %v281_v55  ;;  %v356_v0 = vmul.f32 %v1162_v1, %v282_v56  ;;  %v219_v19 = vld [vmem:[%s1155_s8 + $0x120] sm:$0xff] }
  0x63   : > { %v800_v48 = vpop.eup %799  ;;  %551 = vst [vmem:[%s1208_s20 + $0x30] sm:$0xff] %v798_v42  ;;  %819 = vpow2.f32 %v435_v20  ;;  %v285_v2 = vmul.f32 %v213_v52, %v213_v52  ;;  %v357_v4 = vmul.f32 %v1162_v1, %v283_v60  ;;  %v358_v5 = vmul.f32 %v1162_v1, %v284_v61 }
  0x64   : > { %v802_v53 = vpop.eup %801  ;;  %552 = vst [vmem:[%s1208_s20 + $0x38] sm:$0xff] %v800_v48  ;;  %821 = vpow2.f32 %v437_v24  ;;  %v286_v6 = vmul.f32 %v214_v57, %v214_v57  ;;  %v453_v10 = vmul.f32 1.442695, %v355_v63  ;;  %v455_v11 = vmul.f32 1.442695, %v356_v0  ;;  %v220_v24 = vld [vmem:[%s1155_s8 + $0x128] sm:$0xff] }
  0x65   : > { %v804_v58 = vpop.eup %803  ;;  %553 = vst [vmem:[%s1208_s20 + $0x40] sm:$0xff] %v802_v53  ;;  %823 = vpow2.f32 %v439_v29  ;;  %v359_v12 = vmul.f32 %v1162_v1, %v285_v2  ;;  %v457_v16 = vmul.f32 1.442695, %v357_v4  ;;  %v459_v17 = vmul.f32 1.442695, %v358_v5  ;;  %v227_v4 = vld [vmem:[%s1155_s8 + $0x160] sm:$0xff] }
  0x66   : > { %v806_v62 = vpop.eup %805  ;;  %554 = vst [vmem:[%s1208_s20 + $0x48] sm:$0xff] %v804_v58  ;;  %825 = vpow2.f32 %v441_v43  ;;  %v360_v18 = vmul.f32 %v1162_v1, %v286_v6  ;;  %v287_v22 = vmul.f32 %v215_v7, %v215_v7  ;;  %v288_v23 = vmul.f32 %v216_v8, %v216_v8  ;;  %v223_v43 = vld [vmem:[%s1155_s8 + $0x140] sm:$0xff]  ;;  %v228_v5 = vld [vmem:[%s1155_s8 + $0x168] sm:$0xff] }
  0x67   : > { %v808_v3 = vpop.eup %807  ;;  %555 = vst [vmem:[%s1208_s20 + $0x50] sm:$0xff] %v806_v62  ;;  %827 = vpow2.f32 %v443_v44  ;;  %v461_v21 = vmul.f32 1.442695, %v359_v12  ;;  %v289_v27 = vmul.f32 %v217_v13, %v217_v13  ;;  %v290_v28 = vmul.f32 %v218_v14, %v218_v14  ;;  %v224_v44 = vld [vmem:[%s1155_s8 + $0x148] sm:$0xff] }
  0x68   : > { %v810_v9 = vpop.eup %809  ;;  %556 = vst [vmem:[%s1208_s20 + $0x58] sm:$0xff] %v808_v3  ;;  %829 = vpow2.f32 %v445_v49  ;;  %v463_v26 = vmul.f32 1.442695, %v360_v18  ;;  %v361_v30 = vmul.f32 %v1162_v1, %v287_v22  ;;  %v362_v31 = vmul.f32 %v1162_v1, %v288_v23  ;;  %v225_v49 = vld [vmem:[%s1155_s8 + $0x150] sm:$0xff] }
  0x69   : > { %v812_v15 = vpop.eup %811  ;;  %557 = vst [vmem:[%s1208_s20 + $0x60] sm:$0xff] %v810_v9  ;;  %831 = vpow2.f32 %v447_v50  ;;  %v291_v32 = vmul.f32 %v219_v19, %v219_v19  ;;  %v363_v34 = vmul.f32 %v1162_v1, %v289_v27  ;;  %v364_v35 = vmul.f32 %v1162_v1, %v290_v28 }
  0x6a   : > { %v814_v20 = vpop.eup %813  ;;  %558 = vst [vmem:[%s1208_s20 + $0x68] sm:$0xff] %v812_v15  ;;  %833 = vpow2.f32 %v449_v54  ;;  %v292_v36 = vmul.f32 %v220_v24, %v220_v24  ;;  %v465_v40 = vmul.f32 1.442695, %v361_v30  ;;  %v467_v41 = vmul.f32 1.442695, %v362_v31  ;;  %v226_v54 = vld [vmem:[%s1155_s8 + $0x158] sm:$0xff] }
  0x6b   : > { %v816_v25 = vpop.eup %815  ;;  %559 = vst [vmem:[%s1208_s20 + $0x70] sm:$0xff] %v814_v20  ;;  %835 = vpow2.f32 %v451_v59  ;;  %v365_v42 = vmul.f32 %v1162_v1, %v291_v32  ;;  %v469_v46 = vmul.f32 1.442695, %v363_v34  ;;  %v471_v47 = vmul.f32 1.442695, %v364_v35  ;;  %v233_v34 = vld [vmem:[%s1155_s8 + $0x190] sm:$0xff] }
  0x6c   : > { %v818_v29 = vpop.eup %817  ;;  %560 = vst [vmem:[%s1208_s20 + $0x78] sm:$0xff] %v816_v25  ;;  %837 = vpow2.f32 %v453_v10  ;;  %v366_v48 = vmul.f32 %v1162_v1, %v292_v36  ;;  %v293_v52 = vmul.f32 %v221_v37, %v221_v37  ;;  %v294_v53 = vmul.f32 %v222_v38, %v222_v38  ;;  %v229_v10 = vld [vmem:[%s1155_s8 + $0x170] sm:$0xff]  ;;  %v234_v35 = vld [vmem:[%s1155_s8 + $0x198] sm:$0xff] }
  0x6d   : > { %v820_v33 = vpop.eup %819  ;;  %561 = vst [vmem:[%s1208_s20 + $0x80] sm:$0xff] %v818_v29  ;;  %839 = vpow2.f32 %v455_v11  ;;  %v473_v51 = vmul.f32 1.442695, %v365_v42  ;;  %v295_v57 = vmul.f32 %v223_v43, %v223_v43  ;;  %v296_v58 = vmul.f32 %v224_v44, %v224_v44  ;;  %v230_v11 = vld [vmem:[%s1155_s8 + $0x178] sm:$0xff] }
  0x6e   : > { %v822_v39 = vpop.eup %821  ;;  %562 = vst [vmem:[%s1208_s20 + $0x88] sm:$0xff] %v820_v33  ;;  %841 = vpow2.f32 %v457_v16  ;;  %v475_v56 = vmul.f32 1.442695, %v366_v48  ;;  %v367_v60 = vmul.f32 %v1162_v1, %v293_v52  ;;  %v368_v61 = vmul.f32 %v1162_v1, %v294_v53  ;;  %v231_v16 = vld [vmem:[%s1155_s8 + $0x180] sm:$0xff] }
  0x6f   : > { %v824_v45 = vpop.eup %823  ;;  %563 = vst [vmem:[%s1208_s20 + $0x90] sm:$0xff] %v822_v39  ;;  %843 = vpow2.f32 %v459_v17  ;;  %v297_v62 = vmul.f32 %v225_v49, %v225_v49  ;;  %v369_v0 = vmul.f32 %v1162_v1, %v295_v57  ;;  %v370_v2 = vmul.f32 %v1162_v1, %v296_v58 }
  0x70   : > { %v826_v50 = vpop.eup %825  ;;  %564 = vst [vmem:[%s1208_s20 + $0x98] sm:$0xff] %v824_v45  ;;  %845 = vpow2.f32 %v461_v21  ;;  %v298_v3 = vmul.f32 %v226_v54, %v226_v54  ;;  %v477_v7 = vmul.f32 1.442695, %v367_v60  ;;  %v479_v8 = vmul.f32 1.442695, %v368_v61  ;;  %v232_v21 = vld [vmem:[%s1155_s8 + $0x188] sm:$0xff] }
  0x71   : > { %v828_v55 = vpop.eup %827  ;;  %565 = vst [vmem:[%s1208_s20 + $0xa0] sm:$0xff] %v826_v50  ;;  %847 = vpow2.f32 %v463_v26  ;;  %v371_v9 = vmul.f32 %v1162_v1, %v297_v62  ;;  %v481_v13 = vmul.f32 1.442695, %v369_v0  ;;  %v483_v14 = vmul.f32 1.442695, %v370_v2  ;;  %v239_v0 = vld [vmem:[%s1155_s8 + $0x1c0] sm:$0xff] }
  0x72   : > { %v830_v59 = vpop.eup %829  ;;  %566 = vst [vmem:[%s1208_s20 + $0xa8] sm:$0xff] %v828_v55  ;;  %849 = vpow2.f32 %v465_v40  ;;  %v372_v15 = vmul.f32 %v1162_v1, %v298_v3  ;;  %v299_v19 = vmul.f32 %v227_v4, %v227_v4  ;;  %v300_v20 = vmul.f32 %v228_v5, %v228_v5  ;;  %v235_v40 = vld [vmem:[%s1155_s8 + $0x1a0] sm:$0xff]  ;;  %v240_v2 = vld [vmem:[%s1155_s8 + $0x1c8] sm:$0xff] }
  0x73   : > { %v832_v63 = vpop.eup %831  ;;  %567 = vst [vmem:[%s1208_s20 + $0xb0] sm:$0xff] %v830_v59  ;;  %851 = vpow2.f32 %v467_v41  ;;  %v485_v18 = vmul.f32 1.442695, %v371_v9  ;;  %v301_v24 = vmul.f32 %v229_v10, %v229_v10  ;;  %v302_v25 = vmul.f32 %v230_v11, %v230_v11  ;;  %v236_v41 = vld [vmem:[%s1155_s8 + $0x1a8] sm:$0xff] }
  0x74   : > { %v834_v6 = vpop.eup %833  ;;  %568 = vst [vmem:[%s1208_s20 + $0xb8] sm:$0xff] %v832_v63  ;;  %853 = vpow2.f32 %v469_v46  ;;  %v487_v23 = vmul.f32 1.442695, %v372_v15  ;;  %v373_v27 = vmul.f32 %v1162_v1, %v299_v19  ;;  %v374_v28 = vmul.f32 %v1162_v1, %v300_v20  ;;  %v237_v46 = vld [vmem:[%s1155_s8 + $0x1b0] sm:$0xff] }
  0x75   : > { %v836_v12 = vpop.eup %835  ;;  %569 = vst [vmem:[%s1208_s20 + $0xc0] sm:$0xff] %v834_v6  ;;  %855 = vpow2.f32 %v471_v47  ;;  %v303_v29 = vmul.f32 %v231_v16, %v231_v16  ;;  %v375_v31 = vmul.f32 %v1162_v1, %v301_v24  ;;  %v376_v32 = vmul.f32 %v1162_v1, %v302_v25 }
  0x76   : > { %v838_v17 = vpop.eup %837  ;;  %570 = vst [vmem:[%s1208_s20 + $0xc8] sm:$0xff] %v836_v12  ;;  %857 = vpow2.f32 %v473_v51  ;;  %v304_v33 = vmul.f32 %v232_v21, %v232_v21  ;;  %v489_v37 = vmul.f32 1.442695, %v373_v27  ;;  %v491_v38 = vmul.f32 1.442695, %v374_v28  ;;  %v238_v51 = vld [vmem:[%s1155_s8 + $0x1b8] sm:$0xff] }
  0x77   : > { %v840_v22 = vpop.eup %839  ;;  %571 = vst [vmem:[%s1208_s20 + $0xd0] sm:$0xff] %v838_v17  ;;  %859 = vpow2.f32 %v475_v56  ;;  %v377_v39 = vmul.f32 %v1162_v1, %v303_v29  ;;  %v493_v43 = vmul.f32 1.442695, %v375_v31  ;;  %v495_v44 = vmul.f32 1.442695, %v376_v32  ;;  %v245_v31 = vld [vmem:[%s1155_s8 + $0x1f0] sm:$0xff] }
  0x78   : > { %v842_v26 = vpop.eup %841  ;;  %572 = vst [vmem:[%s1208_s20 + $0xd8] sm:$0xff] %v840_v22  ;;  %861 = vpow2.f32 %v477_v7  ;;  %v378_v45 = vmul.f32 %v1162_v1, %v304_v33  ;;  %v305_v49 = vmul.f32 %v233_v34, %v233_v34  ;;  %v306_v50 = vmul.f32 %v234_v35, %v234_v35  ;;  %v241_v7 = vld [vmem:[%s1155_s8 + $0x1d0] sm:$0xff]  ;;  %v246_v32 = vld [vmem:[%s1155_s8 + $0x1f8] sm:$0xff] }
  0x79   : > { %v844_v30 = vpop.eup %843  ;;  %573 = vst [vmem:[%s1208_s20 + $0xe0] sm:$0xff] %v842_v26  ;;  %863 = vpow2.f32 %v479_v8  ;;  %v497_v48 = vmul.f32 1.442695, %v377_v39  ;;  %v307_v54 = vmul.f32 %v235_v40, %v235_v40  ;;  %v308_v55 = vmul.f32 %v236_v41, %v236_v41  ;;  %v242_v8 = vld [vmem:[%s1155_s8 + $0x1d8] sm:$0xff] }
  0x7a   : > { %v846_v36 = vpop.eup %845  ;;  %574 = vst [vmem:[%s1208_s20 + $0xe8] sm:$0xff] %v844_v30  ;;  %865 = vpow2.f32 %v481_v13  ;;  %v499_v53 = vmul.f32 1.442695, %v378_v45  ;;  %v379_v57 = vmul.f32 %v1162_v1, %v305_v49  ;;  %v380_v58 = vmul.f32 %v1162_v1, %v306_v50  ;;  %v243_v13 = vld [vmem:[%s1155_s8 + $0x1e0] sm:$0xff] }
  0x7b   : > { %v848_v42 = vpop.eup %847  ;;  %575 = vst [vmem:[%s1208_s20 + $0xf0] sm:$0xff] %v846_v36  ;;  %867 = vpow2.f32 %v483_v14  ;;  %v309_v59 = vmul.f32 %v237_v46, %v237_v46  ;;  %v381_v61 = vmul.f32 %v1162_v1, %v307_v54  ;;  %v382_v62 = vmul.f32 %v1162_v1, %v308_v55 }
  0x7c   : > { %v850_v47 = vpop.eup %849  ;;  %576 = vst [vmem:[%s1208_s20 + $0xf8] sm:$0xff] %v848_v42  ;;  %869 = vpow2.f32 %v485_v18  ;;  %v310_v63 = vmul.f32 %v238_v51, %v238_v51  ;;  %v501_v4 = vmul.f32 1.442695, %v379_v57  ;;  %v503_v5 = vmul.f32 1.442695, %v380_v58  ;;  %v244_v18 = vld [vmem:[%s1155_s8 + $0x1e8] sm:$0xff] }
  0x7d   : > { %v852_v52 = vpop.eup %851  ;;  %577 = vst [vmem:[%s1208_s20 + $0x100] sm:$0xff] %v850_v47  ;;  %871 = vpow2.f32 %v487_v23  ;;  %v383_v6 = vmul.f32 %v1162_v1, %v309_v59  ;;  %v505_v10 = vmul.f32 1.442695, %v381_v61  ;;  %v507_v11 = vmul.f32 1.442695, %v382_v62  ;;  %v251_v61 = vld [vmem:[%s1155_s8 + $0x220] sm:$0xff] }
  0x7e   : > { %v854_v56 = vpop.eup %853  ;;  %578 = vst [vmem:[%s1208_s20 + $0x108] sm:$0xff] %v852_v52  ;;  %873 = vpow2.f32 %v489_v37  ;;  %v384_v12 = vmul.f32 %v1162_v1, %v310_v63  ;;  %v311_v16 = vmul.f32 %v239_v0, %v239_v0  ;;  %v312_v17 = vmul.f32 %v240_v2, %v240_v2  ;;  %v247_v37 = vld [vmem:[%s1155_s8 + $0x200] sm:$0xff]  ;;  %v252_v62 = vld [vmem:[%s1155_s8 + $0x228] sm:$0xff] }
  0x7f   : > { %v856_v60 = vpop.eup %855  ;;  %579 = vst [vmem:[%s1208_s20 + $0x110] sm:$0xff] %v854_v56  ;;  %875 = vpow2.f32 %v491_v38  ;;  %v509_v15 = vmul.f32 1.442695, %v383_v6  ;;  %v313_v21 = vmul.f32 %v241_v7, %v241_v7  ;;  %v314_v22 = vmul.f32 %v242_v8, %v242_v8  ;;  %v248_v38 = vld [vmem:[%s1155_s8 + $0x208] sm:$0xff] }
  0x80   : > { %v858_v3 = vpop.eup %857  ;;  %580 = vst [vmem:[%s1208_s20 + $0x118] sm:$0xff] %v856_v60  ;;  %877 = vpow2.f32 %v493_v43  ;;  %v511_v20 = vmul.f32 1.442695, %v384_v12  ;;  %v385_v24 = vmul.f32 %v1162_v1, %v311_v16  ;;  %v386_v25 = vmul.f32 %v1162_v1, %v312_v17  ;;  %v249_v43 = vld [vmem:[%s1155_s8 + $0x210] sm:$0xff] }
  0x81   : > { %v860_v9 = vpop.eup %859  ;;  %581 = vst [vmem:[%s1208_s20 + $0x120] sm:$0xff] %v858_v3  ;;  %879 = vpow2.f32 %v495_v44  ;;  %v315_v26 = vmul.f32 %v243_v13, %v243_v13  ;;  %v387_v28 = vmul.f32 %v1162_v1, %v313_v21  ;;  %v388_v29 = vmul.f32 %v1162_v1, %v314_v22  ;;  %v253_v3 = vld [vmem:[%s1155_s8 + $0x230] sm:$0xff] }
  0x82   : > { %v862_v14 = vpop.eup %861  ;;  %582 = vst [vmem:[%s1208_s20 + $0x128] sm:$0xff] %v860_v9  ;;  %881 = vpow2.f32 %v497_v48  ;;  %v316_v30 = vmul.f32 %v244_v18, %v244_v18  ;;  %v513_v34 = vmul.f32 1.442695, %v385_v24  ;;  %v515_v35 = vmul.f32 1.442695, %v386_v25  ;;  %v250_v48 = vld [vmem:[%s1155_s8 + $0x218] sm:$0xff] }
  0x83   : > { %v864_v19 = vpop.eup %863  ;;  %583 = vst [vmem:[%s1208_s20 + $0x130] sm:$0xff] %v862_v14  ;;  %883 = vpow2.f32 %v499_v53  ;;  %v389_v36 = vmul.f32 %v1162_v1, %v315_v26  ;;  %v517_v40 = vmul.f32 1.442695, %v387_v28  ;;  %v519_v41 = vmul.f32 1.442695, %v388_v29 }
  0x84   : > { %v866_v23 = vpop.eup %865  ;;  %584 = vst [vmem:[%s1208_s20 + $0x138] sm:$0xff] %v864_v19  ;;  %885 = vpow2.f32 %v501_v4  ;;  %v390_v42 = vmul.f32 %v1162_v1, %v316_v30  ;;  %v317_v46 = vmul.f32 %v245_v31, %v245_v31  ;;  %v318_v47 = vmul.f32 %v246_v32, %v246_v32  ;;  %v254_v4 = vld [vmem:[%s1155_s8 + $0x238] sm:$0xff] }
  0x85   : > { %v868_v27 = vpop.eup %867  ;;  %585 = vst [vmem:[%s1208_s20 + $0x140] sm:$0xff] %v866_v23  ;;  %887 = vpow2.f32 %v503_v5  ;;  %v521_v45 = vmul.f32 1.442695, %v389_v36  ;;  %v319_v51 = vmul.f32 %v247_v37, %v247_v37  ;;  %v320_v52 = vmul.f32 %v248_v38, %v248_v38 }
  0x86   : > { %v870_v33 = vpop.eup %869  ;;  %586 = vst [vmem:[%s1208_s20 + $0x148] sm:$0xff] %v868_v27  ;;  %889 = vpow2.f32 %v505_v10  ;;  %v523_v50 = vmul.f32 1.442695, %v390_v42  ;;  %v391_v54 = vmul.f32 %v1162_v1, %v317_v46  ;;  %v392_v55 = vmul.f32 %v1162_v1, %v318_v47 }
  0x87   : > { %v872_v39 = vpop.eup %871  ;;  %587 = vst [vmem:[%s1208_s20 + $0x150] sm:$0xff] %v870_v33  ;;  %891 = vpow2.f32 %v507_v11  ;;  %v321_v56 = vmul.f32 %v249_v43, %v249_v43  ;;  %v393_v58 = vmul.f32 %v1162_v1, %v319_v51  ;;  %v394_v59 = vmul.f32 %v1162_v1, %v320_v52 }
  0x88   : > { %v874_v44 = vpop.eup %873  ;;  %588 = vst [vmem:[%s1208_s20 + $0x158] sm:$0xff] %v872_v39  ;;  %893 = vpow2.f32 %v509_v15  ;;  %v322_v60 = vmul.f32 %v250_v48, %v250_v48  ;;  %v525_v0 = vmul.f32 1.442695, %v391_v54  ;;  %v527_v6 = vmul.f32 1.442695, %v392_v55 }
  0x89   : > { %v876_v49 = vpop.eup %875  ;;  %589 = vst [vmem:[%s1208_s20 + $0x160] sm:$0xff] %v874_v44  ;;  %895 = vpow2.f32 %v511_v20  ;;  %v395_v2 = vmul.f32 %v1162_v1, %v321_v56  ;;  %v529_v9 = vmul.f32 1.442695, %v393_v58  ;;  %v323_v10 = vmul.f32 %v251_v61, %v251_v61 }
  0x8a   : > { %v878_v53 = vpop.eup %877  ;;  %590 = vst [vmem:[%s1208_s20 + $0x168] sm:$0xff] %v876_v49  ;;  %897 = vpow2.f32 %v513_v34  ;;  %v396_v7 = vmul.f32 %v1162_v1, %v322_v60  ;;  %v324_v11 = vmul.f32 %v252_v62, %v252_v62  ;;  %v531_v13 = vmul.f32 1.442695, %v394_v59 }
  0x8b   : > { %v880_v57 = vpop.eup %879  ;;  %591 = vst [vmem:[%s1208_s20 + $0x170] sm:$0xff] %v878_v53  ;;  %899 = vpow2.f32 %v515_v35  ;;  %v325_v14 = vmul.f32 %v253_v3, %v253_v3  ;;  %v326_v15 = vmul.f32 %v254_v4, %v254_v4  ;;  %v533_v17 = vmul.f32 1.442695, %v395_v2 }
  0x8c   : > { %v882_v63 = vpop.eup %881  ;;  %592 = vst [vmem:[%s1208_s20 + $0x178] sm:$0xff] %v880_v57  ;;  %901 = vpow2.f32 %v517_v40  ;;  %v397_v18 = vmul.f32 %v1162_v1, %v323_v10  ;;  %v398_v19 = vmul.f32 %v1162_v1, %v324_v11  ;;  %v535_v21 = vmul.f32 1.442695, %v396_v7 }
  0x8d   : > { %v884_v5 = vpop.eup %883  ;;  %593 = vst [vmem:[%s1208_s20 + $0x180] sm:$0xff] %v882_v63  ;;  %903 = vpow2.f32 %v519_v41  ;;  %v399_v22 = vmul.f32 %v1162_v1, %v325_v14  ;;  %v400_v23 = vmul.f32 %v1162_v1, %v326_v15 }
  0x8e   : > { %v886_v8 = vpop.eup %885  ;;  %594 = vst [vmem:[%s1208_s20 + $0x188] sm:$0xff] %v884_v5  ;;  %905 = vpow2.f32 %v521_v45  ;;  %v537_v25 = vmul.f32 1.442695, %v397_v18  ;;  %v539_v27 = vmul.f32 1.442695, %v398_v19 }
  0x8f   : > { %v888_v12 = vpop.eup %887  ;;  %595 = vst [vmem:[%s1208_s20 + $0x190] sm:$0xff] %v886_v8  ;;  %907 = vpow2.f32 %v523_v50  ;;  %v541_v29 = vmul.f32 1.442695, %v399_v22  ;;  %v543_v1 = vmul.f32 1.442695, %v400_v23 }
  0x90   : > { %v890_v16 = vpop.eup %889  ;;  %596 = vst [vmem:[%s1208_s20 + $0x198] sm:$0xff] %v888_v12  ;;  %909 = vpow2.f32 %v525_v0 }
  0x91   : > { %v892_v20 = vpop.eup %891  ;;  %597 = vst [vmem:[%s1208_s20 + $0x1a0] sm:$0xff] %v890_v16  ;;  %911 = vpow2.f32 %v527_v6 }
  0x92   : > { %v894_v24 = vpop.eup %893  ;;  %598 = vst [vmem:[%s1208_s20 + $0x1a8] sm:$0xff] %v892_v20  ;;  %913 = vpow2.f32 %v529_v9 }
  0x93   : > { %v896_v26 = vpop.eup %895  ;;  %599 = vst [vmem:[%s1208_s20 + $0x1b0] sm:$0xff] %v894_v24  ;;  %915 = vpow2.f32 %v531_v13 }
  0x94   : > { %v898_v28 = vpop.eup %897  ;;  %600 = vst [vmem:[%s1208_s20 + $0x1b8] sm:$0xff] %v896_v26  ;;  %917 = vpow2.f32 %v533_v17 }
  0x95   : > { %v900_v30 = vpop.eup %899  ;;  %601 = vst [vmem:[%s1208_s20 + $0x1c0] sm:$0xff] %v898_v28  ;;  %919 = vpow2.f32 %v535_v21 }
  0x96   : > { %v902_v31 = vpop.eup %901  ;;  %602 = vst [vmem:[%s1208_s20 + $0x1c8] sm:$0xff] %v900_v30  ;;  %921 = vpow2.f32 %v537_v25 }
  0x97   : > { %v904_v32 = vpop.eup %903  ;;  %603 = vst [vmem:[%s1208_s20 + $0x1d0] sm:$0xff] %v902_v31  ;;  %923 = vpow2.f32 %v539_v27 }
  0x98   : > { %v906_v33 = vpop.eup %905  ;;  %604 = vst [vmem:[%s1208_s20 + $0x1d8] sm:$0xff] %v904_v32  ;;  %925 = vpow2.f32 %v541_v29 }
  0x99   : > { %v908_v34 = vpop.eup %907  ;;  %605 = vst [vmem:[%s1208_s20 + $0x1e0] sm:$0xff] %v906_v33  ;;  %927 = vpow2.f32 %v543_v1 }
  0x9a   : > { %v910_v35 = vpop.eup %909  ;;  %606 = vst [vmem:[%s1208_s20 + $0x1e8] sm:$0xff] %v908_v34 }
  0x9b   : > { %v912_v36 = vpop.eup %911  ;;  %607 = vst [vmem:[%s1208_s20 + $0x1f0] sm:$0xff] %v910_v35 }
  0x9c   : > { %v914_v37 = vpop.eup %913  ;;  %608 = vst [vmem:[%s1208_s20 + $0x1f8] sm:$0xff] %v912_v36 }
  0x9d   : > { %v916_v38 = vpop.eup %915  ;;  %609 = vst [vmem:[%s1208_s20 + $0x200] sm:$0xff] %v914_v37 }
  0x9e   : > { %v918_v39 = vpop.eup %917  ;;  %610 = vst [vmem:[%s1208_s20 + $0x208] sm:$0xff] %v916_v38  ;;  %624 = sbr.rel (!%p1093_p9) target bundleno = 193 (0xc1), region = 36 }
  0x9f   : > { %v920_v40 = vpop.eup %919  ;;  %611 = vst [vmem:[%s1208_s20 + $0x210] sm:$0xff] %v918_v39 }
  0xa0   : > { %v922_v41 = vpop.eup %921  ;;  %612 = vst [vmem:[%s1208_s20 + $0x218] sm:$0xff] %v920_v40 }
  0xa1   : > { %v924_v42 = vpop.eup %923  ;;  %613 = vst [vmem:[%s1208_s20 + $0x220] sm:$0xff] %v922_v41 }
  0xa2   : > { %v926_v43 = vpop.eup %925  ;;  %614 = vst [vmem:[%s1208_s20 + $0x228] sm:$0xff] %v924_v42 }
  0xa3   : > { %v928_v44 = vpop.eup %927  ;;  %615 = vst [vmem:[%s1208_s20 + $0x230] sm:$0xff] %v926_v43 }
  0xa4   : > { %616 = vst [vmem:[%s1208_s20 + $0x238] sm:$0xff] %v928_v44 }
  0xa5   : > { %s1462_s7 = smov (!%p627_p6, %s626_s7), 9 }
  0xa6   : > { %s1387_s9 = sshll.u32 %s1462_s7, 10 }
  0xa7   : > { %s632_s10 = ssub.s32 9216, %s1387_s9 }
  0xa8   : > { %633 = vsyncadd %s618_s29, %s632_s10  ;;  %p725_p10 = scmp.ne.s32.totalorder %s1387_s9, 0  ;;  %s739_s21 = smul.u32 9216, %s1070_s0 }
  0xa9   : > { %s639_s15 = sshll.u32 %s1208_s20, 4  ;;  %s1028_s25 = smov [#allocation6]   ;;  %s1400_s15 = int_to_ptr.vmem [resolvable:$true] %s639_s15 }
  0xaa   : > { %s1398_s23 = scalar_lea.hbm %s1448_s2, %s739_s21  ;;  %s957_s24 = scalar_lea.vmem %s1400_s15, %s1387_s9 }
  0xab   : > { %p958_p9 = scmp.ne.s32.totalorder %s1400_s15, %s957_s24  ;;  %s961_s26 = sshll.u32 %s1028_s25, 4  ;;  %s962_s26 = int_to_ptr.vmem [resolvable:$false] %s961_s26 }
  0xac   : > { %s963_s0 = scalar_lea.vmem %s962_s26, 18432  ;;  %p964_p12 = scmp.lt.s32.totalorder %s1400_s15, %s962_s26 }
  0xad   : > { %p959_p11 = pnand %p958_p9, %p725_p10  ;;  %p965_p0 = scmp.lt.s32.totalorder %s963_s0, %s957_s24 }
  0xaf   : > { %p960_p13 = pneg %p959_p11  ;;  %p966_p1 = por %p965_p0, %p964_p12 }
  0xb1   : > { %p967_p3 = pnand %p966_p1, %p960_p13 }
  0xb3   : > { %970 = shalt.err (!%p967_p3)
}
  0xb4   : > { %s971_s28 = scalar_lea.hbm %s1398_s23, %s1387_s9  ;;  %s975_s6 = scalar_lea.hbm %s1448_s2, 17408 }
  0xb5   : > { %p972_p4 = scmp.ne.s32.totalorder %s1398_s23, %s971_s28  ;;  %p976_p7 = scmp.lt.u32.totalorder %s1398_s23, %s1448_s2 }
  0xb6   : > { %p977_p8 = scmp.lt.u32.totalorder %s975_s6, %s971_s28  ;;  %p979_p9 = scmp.lt.u32.totalorder %s971_s28, %s1398_s23 }
  0xb7   : > { %p973_p5 = pnand %p972_p4, %p725_p10 }
  0xb8   : > { %p978_p6 = por %p977_p8, %p976_p7 }
  0xb9   : > { %p974_p2 = pneg %p973_p5 }
  0xba   : > { %p980_p11 = por %p979_p9, %p978_p6 }
  0xbc   : > { %p981_p13 = pnand %p980_p11, %p974_p2 }
  0xbe   : > { %984 = shalt.err (!%p981_p13)
}
  0xbf   : > { %s1029_s20 = smov 1024   ;;  %s1030_s4 = smov 64  }
  0xc0   : > { %645 = dma.vmem_to_hbm [thread:$0]  (%p725_p10), %s1400_s15, %s1387_s9, %s1398_s23, %s618_s29, %s1029_s20, %s1029_s20, %s1030_s4  }
  0xc1 PF: > { %s654_s7 = sand.u32 1, %s1011_s11   ;;  %p1453_p12 = scmp.ne.s32.totalorder %s1452_s22, 0 }
  0xc2   : > { %p1454_p0 = scmp.ge.s32.totalorder %s1023_s14, 2  ;;  %s655_s10 = scalar_lea.sflag [#allocation5], %s654_s7 }
  0xc4   : > { %p745_p1 = pnand %p1454_p0, %p1453_p12 }
  0xc6   : > { %1006 = dma.done.wait (!%p745_p1), %s655_s10, 9216  }
  0xc7   : > { %1008 = vsyncadd (!%p745_p1), %s655_s10, 4294958080  ;;  %p16_p3 = scmp.ge.s32.totalorder %s1074_s16, 4   ;;  %s1455_s11 = smov %s1015_s12 }
  0xc8   : > { %s1456_s12 = smov %s1019_s13  ;;  %s1457_s13 = smov %s1086_s19 }
  0xc9   : > { %s1458_s14 = smov %s1074_s16  ;;  %18 = sbr.rel (!%p16_p3) target bundleno = 7 (0x7), region = 73 }
  0xd0   :  { %660 = vsyncpa [#allocation4], 1 }
  0xd1   :  { %662 = vsyncpa [#allocation4 + $0x1], 1 }
  0xd2   :  { %663 = vsyncpa [#allocation5], 1 }
  0xd3   :  { %665 = vsyncpa [#allocation5 + $0x1], 1 }

</bundles_post_ra>
